<compile_context>
chip_gen: v7x
topology: tpu7x:2x2x1
jax: 0.10.0
libtpu: 0.0.40
codegen_flags: <defaults>
</compile_context>

<pallas_src>
import numpy as np
import jax
import jax.numpy as jnp
from jax.experimental import pallas as pl
from jax.experimental.pallas import tpu as pltpu

# ----------------------------- model dims (small, synthetic) ----------------
B = 2            # batch
L = 8            # sequence length
D = 32           # hidden size
HEAD_DIM = 16
NUM_Q = 4        # query heads
NUM_KV = 2       # kv heads
EXPAND = NUM_Q // NUM_KV
VOCAB = 64
ROPE_THETA = 10000.0
COMPRESSION_RATIO = 0.5

N_SLOTS = 2 * NUM_Q              # 4 Q head slots + 4 GQA-expanded K slots
SLAB = N_SLOTS * HEAD_DIM        # 128 lanes: exactly one vreg lane width


# ----------------------------- Pallas kernel --------------------------------
def _attn_importance_kernel(h_ref, w_ref, cos_ref, sin_ref, out_ref):
    """Single invocation over the whole (toy) batch.

    h_ref   : (B, L, D)     bf16 hidden states
    w_ref   : (D, 2*SLAB)   bf16 fused [Wq | Wk_gqa_exp | rot(Wq) | rot(Wk_exp)]
    cos_ref : (L, SLAB)     f32  cos tiled across the 8 head slots (lane-aligned)
    sin_ref : (L, SLAB)     f32
    out_ref : (B, L)        f32  importance (mean over heads & queries)
    """
    Bb, Ll, Dd = h_ref.shape

    # 1) ONE fused lane-dense projection for all head slots plus their
    #    rotate_half counterparts (rotation folded into the weight columns).
    x = h_ref[...].reshape(Bb * Ll, Dd)                                    # bf16
    qk_big = jnp.dot(x, w_ref[...], preferred_element_type=jnp.float32)   # (B*L, 2*SLAB)
    qk_big = qk_big.reshape(Bb, Ll, 2 * SLAB)

    # 2) RoPE on two lane-aligned 128-wide halves (f32 VPU math).  cos/sin are
    #    per-position only; broadcast over batch once, hoisted (no loops here).
    qk = qk_big[..., :SLAB] * cos_ref[...] + qk_big[..., SLAB:] * sin_ref[...]
    qk = qk.astype(jnp.bfloat16)                                           # (B, L, SLAB)

    # 3) Head-major gather: slot h holds Q head h, slot NUM_Q+h its GQA K head
    #    (K duplication was folded into the weights, so this is a plain pairing).
    #    One leading-dim concat each -> (NUM_Q*B, L, HD), rows n = h*B + b.
    q_h = jnp.concatenate(
        [qk[:, :, h * HEAD_DIM:(h + 1) * HEAD_DIM] for h in range(NUM_Q)], axis=0)
    k_h = jnp.concatenate(
        [qk[:, :, (NUM_Q + h) * HEAD_DIM:(NUM_Q + h + 1) * HEAD_DIM]
         for h in range(NUM_Q)], axis=0)

    # 4) ONE batched score matmul: scores = q @ k^T -- NO 1/sqrt(head_dim)
    #    scaling, NO causal mask (faithful to the reference, whose mask is
    #    built but never applied).
    s = jnp.einsum('nqd,nkd->nqk', q_h, k_h,
                   preferred_element_type=jnp.float32)                     # (NUM_Q*B, L, L)

    # 5) ONE softmax chain (single max/exp/sum/approx-reciprocal for all
    #    heads and batches), then one reduction over queries.
    m = jnp.max(s, axis=-1, keepdims=True)
    p = jnp.exp(s - m)
    p = p * pl.reciprocal(jnp.sum(p, axis=-1, keepdims=True), approx=True)
    imp = jnp.sum(p, axis=1)                                               # (NUM_Q*B, L)

    # 6) Head reduction via cheap static sublane slices (rows n = h*B + b),
    #    final 1/(NUM_Q*L) scale fused into the store.
    imp_b = imp[0:Bb]
    for h in range(1, NUM_Q):
        imp_b = imp_b + imp[h * Bb:(h + 1) * Bb]                           # (B, L)
    out_ref[...] = imp_b * (1.0 / float(NUM_Q * Ll))


# ----------------------------- wrapper ---------------------------------------
def rotary_cos_sin(seq_len, head_dim, theta=ROPE_THETA):
    inv_freq = 1.0 / (theta ** (jnp.arange(0, head_dim, 2, dtype=jnp.float32) / head_dim))
    pos = jnp.arange(seq_len, dtype=jnp.float32)
    freqs = pos[:, None] * inv_freq[None, :]                  # (L, head_dim/2)
    emb = jnp.concatenate([freqs, freqs], axis=-1)            # (L, head_dim)
    return jnp.cos(emb), jnp.sin(emb)


def _rotate_half_cols(w_t, n_heads):
    """rotate_half applied to output columns of a transposed projection weight."""
    d = w_t.shape[0]
    half = HEAD_DIM // 2
    w3 = w_t.reshape(d, n_heads, HEAD_DIM)
    wr = jnp.concatenate([-w3[..., half:], w3[..., :half]], axis=-1)
    return wr.reshape(d, n_heads * HEAD_DIM)


def _build_fused_weight(wq, wk):
    """wq: (NUM_Q*HD, D), wk: (NUM_KV*HD, D) in nn.Linear layout ->
    (D, 2*SLAB) bf16: [Wq | Wk expanded to one K column-block per query head
    (GQA repeat_interleave folded into the weights) | rotate_half of both].
    Both halves are exactly 128 lanes -> vreg/MXU aligned, no masked ops."""
    wq_t = wq.T.astype(jnp.float32)                                        # (D, 64)
    wk3 = wk.T.astype(jnp.float32).reshape(-1, NUM_KV, HEAD_DIM)
    wk_exp_t = jnp.repeat(wk3, EXPAND, axis=1).reshape(-1, NUM_Q * HEAD_DIM)  # (D, 64)
    main = jnp.concatenate([wq_t, wk_exp_t], axis=1)                       # (D, SLAB)
    rot = jnp.concatenate([_rotate_half_cols(wq_t, NUM_Q),
                           _rotate_half_cols(wk_exp_t, NUM_Q)], axis=1)    # (D, SLAB)
    return jnp.concatenate([main, rot], axis=1).astype(jnp.bfloat16)       # (D, 2*SLAB)


@jax.jit
def attn_importance(hidden, wq, wk):
    """hidden: (B, L, D) f32 -> importance (B, L) f32 via a single Pallas call."""
    Bb, Ll, Dd = hidden.shape
    cos, sin = rotary_cos_sin(Ll, HEAD_DIM)                   # (L, HD)
    cos_t = jnp.tile(cos, (1, N_SLOTS))                       # (L, SLAB) f32, no batch dup
    sin_t = jnp.tile(sin, (1, N_SLOTS))
    w_big = _build_fused_weight(wq, wk)                       # (D, 2*SLAB) bf16

    # Single grid step: at B=2/L=8 per-step overhead dominates.  At production
    # sizes, add grid=(batch_blocks,) with dimension_semantics=("parallel",)
    # (uses both v7x TensorCores) and give every operand a tiled BlockSpec.
    return pl.pallas_call(
        _attn_importance_kernel,
        out_shape=jax.ShapeDtypeStruct((Bb, Ll), jnp.float32),
        in_specs=[pl.BlockSpec(memory_space=pltpu.MemorySpace.VMEM) for _ in range(4)],
        out_specs=pl.BlockSpec(memory_space=pltpu.MemorySpace.VMEM),
    )(hidden.astype(jnp.bfloat16), w_big, cos_t, sin_t)


def token_pruner_forward(input_ids, emb_table, wq, wk, compression_ratio):
    """Replicates TokenPruner.forward: returns (pruned_ids, keep_idx, importance)."""
    Bb, Ll = input_ids.shape
    embs = emb_table[input_ids]                               # (B, L, D) embedding lookup (glue)

    # hot path in Pallas: fused q/k proj + RoPE + scores + softmax + importance mean
    importance = attn_importance(embs, wq, wk)                # (B, L)

    k = max(int(Ll * compression_ratio), 2)
    _, topk = jax.lax.top_k(importance, k)                    # device-side glue
    topk = jnp.sort(topk, axis=-1)

    # Batch-level "append last token" exactly as the reference (torch .any()
    # appends to every row).  The output shape is data-dependent, so a single
    # scalar device->host sync is the minimum possible; everything else stays
    # on device (no full-array np.asarray round-trip).
    if bool(jnp.any(topk[:, -1] != Ll - 1)):
        last = jnp.full((Bb, 1), Ll - 1, dtype=topk.dtype)
        topk = jnp.concatenate([topk, last], axis=1)
    pruned_ids = jnp.take_along_axis(input_ids, topk, axis=1)
    return pruned_ids, topk, importance


# ----------------------------- pure-JAX reference ----------------------------
def _reference_importance(hidden, wq, wk, cos, sin):
    Bb, Ll, _ = hidden.shape
    q = jnp.einsum("bld,ed->ble", hidden, wq).reshape(Bb, Ll, NUM_Q, HEAD_DIM).transpose(0, 2, 1, 3)
    k = jnp.einsum("bld,ed->ble", hidden, wk).reshape(Bb, Ll, NUM_KV, HEAD_DIM).transpose(0, 2, 1, 3)

    def rot(x):
        h = x.shape[-1] // 2
        return jnp.concatenate([-x[..., h:], x[..., :h]], axis=-1)

    c = cos[None, None]
    s = sin[None, None]
    q = q * c + rot(q) * s
    k = k * c + rot(k) * s
    k = jnp.repeat(k, EXPAND, axis=1)
    scores = jnp.einsum("bhqd,bhkd->bhqk", q, k)
    attn = jax.nn.softmax(scores, axis=-1)
    return attn.mean(axis=1).mean(axis=1)


if __name__ == "__main__":
    key = jax.random.PRNGKey(0)
    k1, k2, k3, k4 = jax.random.split(key, 4)

    input_ids = jax.random.randint(k1, (B, L), 0, VOCAB, dtype=jnp.int32)
    emb_table = jax.random.normal(k2, (VOCAB, D), dtype=jnp.float32) * 0.1
    # nn.Linear weight layout: [out_features, in_features]
    wq = jax.random.normal(k3, (NUM_Q * HEAD_DIM, D), dtype=jnp.float32) * 0.05
    wk = jax.random.normal(k4, (NUM_KV * HEAD_DIM, D), dtype=jnp.float32) * 0.05

    pruned_ids, keep_idx, importance = token_pruner_forward(
        input_ids, emb_table, wq, wk, COMPRESSION_RATIO)
    jax.block_until_ready(importance)
    jax.block_until_ready(pruned_ids)

    # correctness check of the Pallas hot path vs pure-JAX f32 reference
    embs = emb_table[input_ids]
    cos, sin = rotary_cos_sin(L, HEAD_DIM)
    ref = _reference_importance(embs, wq, wk, cos, sin)
    np.testing.assert_allclose(np.asarray(importance), np.asarray(ref),
                               rtol=2e-2, atol=2e-3)

    # TODO(synk): GemmaPrunedModel.forward then re-tokenizes the pruned text and runs
    # the full HF main_model — loading pretrained Gemma weights / tokenizers has no
    # Pallas equivalent, so only the TokenPruner compute path is implemented.
    print("KERNEL_OK")
</pallas_src>

<mosaic_0001>
module attributes {stable_mosaic.version = 11 : i64} {
  func.func @_attn_importance_kernel(%arg0: memref<2x8x32xbf16, #tpu.memory_space<vmem>>, %arg1: memref<32x256xbf16, #tpu.memory_space<vmem>>, %arg2: memref<8x128xf32, #tpu.memory_space<vmem>>, %arg3: memref<8x128xf32, #tpu.memory_space<vmem>>, %arg4: memref<2x8xf32, #tpu.memory_space<vmem>>) attributes {dimension_semantics = [], scalar_prefetch = 0 : i64, scratch_operands = 0 : i64, tpu.core_type = #tpu.core_type<tc>} {
    %c0 = arith.constant 0 : index
    %c0_0 = arith.constant 0 : index
    %c0_1 = arith.constant 0 : index
    %0 = vector.load %arg0[%c0, %c0_0, %c0_1] : memref<2x8x32xbf16, #tpu.memory_space<vmem>>, vector<2x8x32xbf16>
    %1 = vector.shape_cast %0 : vector<2x8x32xbf16> to vector<16x32xbf16>
    %c0_2 = arith.constant 0 : index
    %c0_3 = arith.constant 0 : index
    %2 = vector.load %arg1[%c0_2, %c0_3] : memref<32x256xbf16, #tpu.memory_space<vmem>>, vector<32x256xbf16>
    %cst = arith.constant dense<0.000000e+00> : vector<16x256xf32>
    %3 = tpu.matmul %1, %2, %cst {dimension_numbers = #tpu.dot_dimension_numbers<[1], [0], [0], [1], [0, 0, 1, 1], [], []>} : vector<16x32xbf16>, vector<32x256xbf16>, vector<16x256xf32> -> vector<16x256xf32>
    %4 = vector.shape_cast %3 : vector<16x256xf32> to vector<2x8x256xf32>
    %5 = vector.extract_strided_slice %4 {offsets = [0, 0, 0], sizes = [2, 8, 128], strides = [1, 1, 1]} : vector<2x8x256xf32> to vector<2x8x128xf32>
    %c0_4 = arith.constant 0 : index
    %c0_5 = arith.constant 0 : index
    %6 = vector.load %arg2[%c0_4, %c0_5] : memref<8x128xf32, #tpu.memory_space<vmem>>, vector<8x128xf32>
    %7 = vector.shape_cast %6 : vector<8x128xf32> to vector<1x8x128xf32>
    %8 = vector.broadcast %7 : vector<1x8x128xf32> to vector<2x8x128xf32>
    %9 = arith.mulf %5, %8 : vector<2x8x128xf32>
    %10 = vector.extract_strided_slice %4 {offsets = [0, 0, 128], sizes = [2, 8, 128], strides = [1, 1, 1]} : vector<2x8x256xf32> to vector<2x8x128xf32>
    %c0_6 = arith.constant 0 : index
    %c0_7 = arith.constant 0 : index
    %11 = vector.load %arg3[%c0_6, %c0_7] : memref<8x128xf32, #tpu.memory_space<vmem>>, vector<8x128xf32>
    %12 = vector.shape_cast %11 : vector<8x128xf32> to vector<1x8x128xf32>
    %13 = vector.broadcast %12 : vector<1x8x128xf32> to vector<2x8x128xf32>
    %14 = arith.mulf %10, %13 : vector<2x8x128xf32>
    %15 = arith.addf %9, %14 : vector<2x8x128xf32>
    %16 = arith.truncf %15 : vector<2x8x128xf32> to vector<2x8x128xbf16>
    %17 = vector.extract_strided_slice %16 {offsets = [0, 0, 0], sizes = [2, 8, 16], strides = [1, 1, 1]} : vector<2x8x128xbf16> to vector<2x8x16xbf16>
    %18 = vector.extract_strided_slice %16 {offsets = [0, 0, 16], sizes = [2, 8, 16], strides = [1, 1, 1]} : vector<2x8x128xbf16> to vector<2x8x16xbf16>
    %19 = vector.extract_strided_slice %16 {offsets = [0, 0, 32], sizes = [2, 8, 16], strides = [1, 1, 1]} : vector<2x8x128xbf16> to vector<2x8x16xbf16>
    %20 = vector.extract_strided_slice %16 {offsets = [0, 0, 48], sizes = [2, 8, 16], strides = [1, 1, 1]} : vector<2x8x128xbf16> to vector<2x8x16xbf16>
    %21 = tpu.concatenate %17, %18, %19, %20 in 0 : vector<2x8x16xbf16>, vector<2x8x16xbf16>, vector<2x8x16xbf16>, vector<2x8x16xbf16> -> vector<8x8x16xbf16>
    %22 = vector.extract_strided_slice %16 {offsets = [0, 0, 64], sizes = [2, 8, 16], strides = [1, 1, 1]} : vector<2x8x128xbf16> to vector<2x8x16xbf16>
    %23 = vector.extract_strided_slice %16 {offsets = [0, 0, 80], sizes = [2, 8, 16], strides = [1, 1, 1]} : vector<2x8x128xbf16> to vector<2x8x16xbf16>
    %24 = vector.extract_strided_slice %16 {offsets = [0, 0, 96], sizes = [2, 8, 16], strides = [1, 1, 1]} : vector<2x8x128xbf16> to vector<2x8x16xbf16>
    %25 = vector.extract_strided_slice %16 {offsets = [0, 0, 112], sizes = [2, 8, 16], strides = [1, 1, 1]} : vector<2x8x128xbf16> to vector<2x8x16xbf16>
    %26 = tpu.concatenate %22, %23, %24, %25 in 0 : vector<2x8x16xbf16>, vector<2x8x16xbf16>, vector<2x8x16xbf16>, vector<2x8x16xbf16> -> vector<8x8x16xbf16>
    "tpu.trace_start"() <{level = 10 : i32, message = "nqd,nkd->nqk"}> : () -> ()
    %cst_8 = arith.constant dense<0.000000e+00> : vector<8x8x8xf32>
    %27 = tpu.matmul %21, %26, %cst_8 {dimension_numbers = #tpu.dot_dimension_numbers<[2], [2], [1], [1], [0, 0, 0, 1, 1, 1], [0], [0]>} : vector<8x8x16xbf16>, vector<8x8x16xbf16>, vector<8x8x8xf32> -> vector<8x8x8xf32>
    "tpu.trace_stop"() : () -> ()
    %cst_9 = arith.constant dense<0xFF800000> : vector<8x8xf32>
    %28 = vector.multi_reduction <maximumf>, %27, %cst_9 [2] : vector<8x8x8xf32> to vector<8x8xf32>
    %29 = vector.shape_cast %28 : vector<8x8xf32> to vector<8x8x1xf32>
    %30 = vector.broadcast %29 : vector<8x8x1xf32> to vector<8x8x8xf32>
    %31 = arith.subf %27, %30 : vector<8x8x8xf32>
    %32 = math.exp %31 : vector<8x8x8xf32>
    %cst_10 = arith.constant dense<0.000000e+00> : vector<8x8xf32>
    %33 = vector.multi_reduction <add>, %32, %cst_10 [2] : vector<8x8x8xf32> to vector<8x8xf32>
    %34 = vector.shape_cast %33 : vector<8x8xf32> to vector<8x8x1xf32>
    %35 = tpu.reciprocal %34 {approx = true} : vector<8x8x1xf32> -> vector<8x8x1xf32>
    %36 = vector.broadcast %35 : vector<8x8x1xf32> to vector<8x8x8xf32>
    %37 = arith.mulf %32, %36 : vector<8x8x8xf32>
    %cst_11 = arith.constant dense<0.000000e+00> : vector<8x8xf32>
    %38 = vector.multi_reduction <add>, %37, %cst_11 [1] : vector<8x8x8xf32> to vector<8x8xf32>
    %39 = vector.extract_strided_slice %38 {offsets = [0, 0], sizes = [2, 8], strides = [1, 1]} : vector<8x8xf32> to vector<2x8xf32>
    %40 = vector.extract_strided_slice %38 {offsets = [2, 0], sizes = [2, 8], strides = [1, 1]} : vector<8x8xf32> to vector<2x8xf32>
    %41 = arith.addf %39, %40 : vector<2x8xf32>
    %42 = vector.extract_strided_slice %38 {offsets = [4, 0], sizes = [2, 8], strides = [1, 1]} : vector<8x8xf32> to vector<2x8xf32>
    %43 = arith.addf %41, %42 : vector<2x8xf32>
    %44 = vector.extract_strided_slice %38 {offsets = [6, 0], sizes = [2, 8], strides = [1, 1]} : vector<8x8xf32> to vector<2x8xf32>
    %45 = arith.addf %43, %44 : vector<2x8xf32>
    %cst_12 = arith.constant 3.125000e-02 : f32
    %46 = vector.broadcast %cst_12 : f32 to vector<2x8xf32>
    %47 = arith.mulf %45, %46 : vector<2x8xf32>
    %c0_13 = arith.constant 0 : index
    %c0_14 = arith.constant 0 : index
    %48 = vector.load %arg4[%c0_13, %c0_14] : memref<2x8xf32, #tpu.memory_space<vmem>>, vector<2x8xf32>
    tpu.vector_store %arg4[%c0_13, %c0_14], %47 {strides = array<i32>} : memref<2x8xf32, #tpu.memory_space<vmem>>, vector<2x8xf32>,
    return
  }
}

</mosaic_0001>

<bundles_post_ra>
// kernel: tile.14
= control target key start
LH: loop header
LB: loop body
LE: loop exit
PB: predicated region body
PF: predicated region fallthrough
CT: control target
= control target key end

     0   :  { %vm4_vm0 = vcmask 1047556   ;;  %s99_s14 = smov 112   ;;  %s100_s19 = smov 80   ;;  %vm6_vm1 = vcmask 130048   ;;  %vm16_vm2 = vcmask 1048448   ;;  %vm26_vm3 = vcmask 917248   ;;  %s196_s0 = inlined_call_operand.vmem [shape: f32[8,8,16], index: 0, kind: input, shape index: {}]   ;;  %s197_s1 = inlined_call_operand.vmem [shape: f32[8,128], index: 1, kind: output, shape index: {}]  }
   0x1   :  { %v78_v0 = vld [vmem:[%s196_s0 + $0x7] ss:$8 sm:$0xf]   ;;  %v82_v3 = vld [vmem:[%s196_s0 + $0x5] ss:$8 sm:$0xf]  }
   0x2   :  { %v79_v1 = vld [vmem:[%s196_s0 + $0x7] ss:$8 sm:$0xf0]   ;;  %v83_v4 = vld [vmem:[%s196_s0 + $0x5] ss:$8 sm:$0xf0]  }
   0x3   :  { %v13_v2 = vsel %vm4_vm0, %v79_v1, %v78_v0  ;;  %v33_v5 = vsel %vm4_vm0, %v83_v4, %v82_v3  ;;  %v80_v6 = vld [vmem:[%s196_s0 + $0x6] ss:$8 sm:$0xf]   ;;  %v84_v9 = vld [vmem:[%s196_s0 + $0x4] ss:$8 sm:$0xf]  }
   0x4   :  { %14 = vrot.lane.b32.xlu0 %v13_v2, %s99_s14  ;;  %v81_v7 = vld [vmem:[%s196_s0 + $0x6] ss:$8 sm:$0xf0]   ;;  %34 = vrot.lane.b32.xlu1 %v33_v5, %s100_s19  ;;  %v85_v10 = vld [vmem:[%s196_s0 + $0x4] ss:$8 sm:$0xf0]  }
   0x5   :  { %v23_v8 = vsel %vm4_vm0, %v81_v7, %v80_v6  ;;  %v86_v11 = vld [vmem:[%s196_s0 + $0x3] ss:$8 sm:$0xf]   ;;  %v43_v12 = vsel %vm4_vm0, %v85_v10, %v84_v9  ;;  %s101_s28 = smov 96   ;;  %s102_s4 = smov 64   ;;  %vm36_vm4 = vcmask 786048  }
   0x6   :  { %v87_v13 = vld [vmem:[%s196_s0 + $0x3] ss:$8 sm:$0xf0]   ;;  %v88_v14 = vld [vmem:[%s196_s0 + $0x2] ss:$8 sm:$0xf]  }
   0x7   :  { %v89_v15 = vld [vmem:[%s196_s0 + $0x2] ss:$8 sm:$0xf0]   ;;  %v53_v16 = vsel %vm4_vm0, %v87_v13, %v86_v11  ;;  %v90_v17 = vld [vmem:[%s196_s0 + $0x1] ss:$8 sm:$0xf]  }
   0x8   :  { %24 = vrot.lane.b32.xlu0 %v23_v8, %s101_s28  ;;  %44 = vrot.lane.b32.xlu1 %v43_v12, %s102_s4  ;;  %v63_v18 = vsel %vm4_vm0, %v89_v15, %v88_v14  ;;  %v91_v19 = vld [vmem:[%s196_s0 + $0x1] ss:$8 sm:$0xf0]   ;;  %v2_v20 = vld [vmem:[%s196_s0] ss:$8 sm:$0xf]  }
   0x9   :  { %v3_v21 = vld [vmem:[%s196_s0] ss:$8 sm:$0xf0]   ;;  %s103_s0 = smov 48   ;;  %s104_s13 = smov 32   ;;  %v73_v23 = vsel %vm4_vm0, %v91_v19, %v90_v17  ;;  %vm46_vm5 = vcmask 654848  }
   0xa   :  { %v5_v22 = vsel %vm4_vm0, %v3_v21, %v2_v20  ;;  %s105_s16 = smov 16   ;;  %vm56_vm6 = vcmask 523648   ;;  %vm66_vm7 = vcmask 392448   ;;  %vm76_vm8 = vcmask 261248  }
   0xb   :  { %7 = vst.msk [vmem:[%s197_s1] sm:$0xff] %vm6_vm1, %v5_v22  }
   0xc   :  { %54 = vrot.lane.b32.xlu0 %v53_v16, %s103_s0  ;;  %64 = vrot.lane.b32.xlu1 %v63_v18, %s104_s13 }
  0x10   :  { %74 = vrot.lane.b32.xlu0 %v73_v23, %s105_s16 }
  0x76   :  { %v15_v24 = vpop.permute.xlu0 %14   ;;  %v35_v25 = vpop.permute.xlu1 %34  }
  0x77   :  { %17 = vst.msk [vmem:[%s197_s1] sm:$0xff] %vm16_vm2, %v15_v24  }
  0x7a   :  { %v25_v26 = vpop.permute.xlu0 %24   ;;  %v45_v27 = vpop.permute.xlu1 %44  }
  0x7b   :  { %27 = vst.msk [vmem:[%s197_s1] sm:$0xff] %vm26_vm3, %v25_v26  }
  0x7c   :  { %37 = vst.msk [vmem:[%s197_s1] sm:$0xff] %vm36_vm4, %v35_v25  }
  0x7d   :  { %47 = vst.msk [vmem:[%s197_s1] sm:$0xff] %vm46_vm5, %v45_v27  }
  0x7e   :  { %v55_v28 = vpop.permute.xlu0 %54   ;;  %v65_v29 = vpop.permute.xlu1 %64  }
  0x7f   :  { %57 = vst.msk [vmem:[%s197_s1] sm:$0xff] %vm56_vm6, %v55_v28  }
  0x80   :  { %67 = vst.msk [vmem:[%s197_s1] sm:$0xff] %vm66_vm7, %v65_v29  }
  0x82   :  { %v75_v30 = vpop.permute.xlu0 %74  }
  0x83   :  { %77 = vst.msk [vmem:[%s197_s1] sm:$0xff] %vm76_vm8, %v75_v30  }

// kernel: attn_importance.1
= control target key start
LH: loop header
LB: loop body
LE: loop exit
PB: predicated region body
PF: predicated region fallthrough
CT: control target
= control target key end

     0   :  { %v829_v2 = vmov 0   ;;  %s967_s0 = inlined_call_operand.vmem [shape: bf16[2,8,32], index: 0, kind: input, shape index: {}]   ;;  %s968_s1 = inlined_call_operand.vmem [shape: bf16[32,256], index: 1, kind: input, shape index: {}]   ;;  %s969_s2 = inlined_call_operand.vmem [shape: f32[8,128], index: 2, kind: input, shape index: {}]   ;;  %s970_s3 = inlined_call_operand.vmem [shape: f32[8,128], index: 3, kind: input, shape index: {}]   ;;  %s971_s4 = inlined_call_operand.hbm [shape: f32[2,8], index: 4, kind: output, shape index: {}]  }
   0x1   :  { %v766_v0 = vld [vmem:[%s968_s1 + $0x4] ss:$8 sps:$4 sm:$0xff]   ;;  %v768_v1 = vld [vmem:[%s968_s1] ss:$8 sps:$4 sm:$0xff]   ;;  %86 = vmatprep.mubr.bf16.mxu0 %v829_v2  ;;  %v769_v3 = vld [vmem:[%s968_s1 + $0x14] ss:$8 sps:$4 sm:$0xff]  }
   0x2   :  { %54 = vmatprep.subr.bf16.mxu0 %v766_v0  ;;  %v771_v4 = vld [vmem:[%s968_s1 + $0x10] ss:$8 sps:$4 sm:$0xff]  }
   0x3   :  { %55 = vmatpush1.bf16.msra.mxu0 %v768_v1 }
   0x4   :  { %9 = vsyncpa [#allocation3], 0  ;;  %56 = vmatprep.subr.bf16.mxu0 %v769_v3  ;;  %v772_v5 = vld [vmem:[%s967_s0] sm:$0xff]   ;;  %vm50_vm0 = vcmask 261120   ;;  %v830_v19 = vmov 0.0   ;;  %s831_s0 = smov 96  }
   0x5   :  { %v97_v6 = vld [vmem:[%s969_s2] sm:$0xff]  ;;  %710 = vmatprep.subr.bf16.mxu1 %v830_v19  ;;  %s832_s1 = smov 112   ;;  %vm833_vm1 = vmmov 0   ;;  %s834_s2 = smov 80   ;;  %vm123_vm2 = vcmask 130048   ;;  %vm506_vm3 = vcmask 64512  }
   0x6   :  { %v100_v7 = vld [vmem:[%s970_s3] sm:$0xff]  ;;  %712 = vmatprep.mubr.msk.bf16.mxu1 %vm833_vm1, %v830_v19  ;;  %s835_s3 = smov 64   ;;  %s836_s29 = smov [#allocation2]   ;;  %vm661_vm4 = vcmask 1041409   ;;  %vm664_vm5 = vcmask 58368  }
   0x7   :  { %57 = vmatpush1.bf16.msra.mxu0 %v771_v4  ;;  %s672_s30 = sshll.u32 %s836_s29, 4  ;;  %s673_s30 = int_to_ptr.vmem [resolvable:$true] %s672_s30 }
   0x8   :  { %716 = vmatprep.subr.bf16.mxu0 %v830_v19  ;;  %s805_s5 = scalar_lea.vmem %s673_s30, 32  ;;  %p810_p1 = scmp.lt.s32.totalorder %s673_s30, %s673_s30 }
   0x9   :  { %p806_p0 = scmp.ne.s32.totalorder %s673_s30, %s805_s5  ;;  %p811_p2 = scmp.lt.s32.totalorder %s805_s5, %s805_s5 }
   0xa   :  { %685 = vmatmul.mubr.msk.bf16.vlgmr.msra.gmra.mrb[0].mxu0 %vm50_vm0, %v772_v5 }
   0xb   :  { %718 = vmatprep.mubr.msk.bf16.mxu0 %vm833_vm1, %v830_v19  ;;  %p812_p3 = por %p811_p2, %p810_p1 }
   0xd   :  { %p813_p4 = pnand %p812_p3, %p806_p0 }
  0xdd   :  { %v88_v8 = vpop.f32.mrb[0].mxu0 }
  0xde   :  { %v98_v9 = vmul.f32 %v97_v6, %v88_v8  ;;  %v90_v10 = vpop.f32.mrb[1].mxu0 }
  0xdf   :  { %v101_v11 = vmul.f32 %v100_v7, %v90_v10  ;;  %v92_v12 = vpop.f32.mrb[2].mxu0 }
  0xe0   :  { %v99_v13 = vmul.f32 %v97_v6, %v92_v12  ;;  %v94_v14 = vpop.f32.mrb[3].mxu0 }
  0xe1   :  { %v103_v15 = vadd.f32 %v101_v11, %v98_v9  ;;  %v102_v16 = vmul.f32 %v100_v7, %v94_v14 }
  0xe3   :  { %v105_v17 = vpack.c.bf16 %v103_v15, %v103_v15  ;;  %v104_v18 = vadd.f32 %v102_v16, %v99_v13 }
  0xe5   :  { %113 = vrot.lane.b32.xlu1 %v105_v17, %s831_s0  ;;  %109 = vrot.lane.b32.xlu0 %v105_v17, %s832_s1  ;;  %v106_v20 = vpack.c.bf16 %v104_v18, %v104_v18 }
  0xe9   :  { %115 = vrot.lane.b32.xlu1 %v106_v20, %s831_s0  ;;  %111 = vrot.lane.b32.xlu0 %v106_v20, %s832_s1 }
  0xed   :  { %119 = vrot.lane.b32.xlu1 %v106_v20, %s834_s2  ;;  %117 = vrot.lane.b32.xlu0 %v105_v17, %s834_s2 }
  0xf1   :  { %170 = vrot.lane.b32.xlu1 %v106_v20, %s835_s3  ;;  %121 = vrot.lane.b32.xlu0 %v105_v17, %s835_s3 }
 0x157   :  { %v114_v21 = vpop.permute.xlu1 %113  ;;  %v110_v22 = vpop.permute.xlu0 %109 }
 0x158   :  { %218 = vrot.lane.b32.xlu0 %v110_v22, %s835_s3 }
 0x15b   :  { %v116_v23 = vpop.permute.xlu1 %115  ;;  %v112_v24 = vpop.permute.xlu0 %111 }
 0x15c   :  { %314 = vrot.lane.b32.xlu0 %v114_v21, %s835_s3  ;;  %266 = vrot.lane.b32.xlu1 %v112_v24, %s835_s3 }
 0x15f   :  { %v120_v25 = vpop.permute.xlu1 %119  ;;  %v118_v26 = vpop.permute.xlu0 %117 }
 0x160   :  { %362 = vrot.lane.b32.xlu1 %v116_v23, %s835_s3  ;;  %410 = vrot.lane.b32.xlu0 %v118_v26, %s835_s3 }
 0x163   :  { %v171_v27 = vpop.permute.xlu1 %170  ;;  %v122_v28 = vpop.permute.xlu0 %121 }
 0x164   :  { %v176_v29 = vsel %vm123_vm2, %v171_v27, 0  ;;  %458 = vrot.lane.b32.xlu1 %v120_v25, %s835_s3  ;;  %v128_v30 = vsel %vm123_vm2, %v122_v28, 0 }
 0x165   :  { %711 = vmatpush3.bf16.xpose.msra.mxu1 %v128_v30  ;;  %717 = vmatpush3.bf16.xpose.msra.mxu0 %v176_v29 }
 0x166   :  { %722 = vmatprep.subr.bf16.mxu1 %v830_v19  ;;  %728 = vmatprep.subr.bf16.mxu0 %v830_v19 }
 0x16c   :  { %713 = vmatmul.mubr.msk.bf16.vlgmr.msra.gmra.mrb[0].mxu1 %vm123_vm2, %v105_v17  ;;  %719 = vmatmul.mubr.msk.bf16.vlgmr.msra.gmra.mrb[4].mxu0 %vm123_vm2, %v106_v20 }
 0x16d   :  { %724 = vmatprep.mubr.msk.bf16.mxu1 %vm833_vm1, %v830_v19  ;;  %730 = vmatprep.mubr.msk.bf16.mxu0 %vm833_vm1, %v830_v19 }
 0x1ca   :  { %v219_v31 = vpop.permute.xlu0 %218 }
 0x1cb   :  { %v224_v32 = vsel %vm123_vm2, %v219_v31, 0 }
 0x1cc   :  { %723 = vmatpush3.bf16.xpose.msra.mxu1 %v224_v32 }
 0x1cd   :  { %734 = vmatprep.subr.bf16.mxu1 %v830_v19 }
 0x1ce   :  { %v267_v33 = vpop.permute.xlu1 %266  ;;  %v315_v35 = vpop.permute.xlu0 %314 }
 0x1cf   :  { %v272_v34 = vsel %vm123_vm2, %v267_v33, 0  ;;  %v320_v36 = vsel %vm123_vm2, %v315_v35, 0 }
 0x1d0   :  { %729 = vmatpush3.bf16.xpose.msra.mxu0 %v272_v34 }
 0x1d1   :  { %740 = vmatprep.subr.bf16.mxu0 %v830_v19 }
 0x1d2   :  { %v363_v37 = vpop.permute.xlu1 %362  ;;  %v411_v39 = vpop.permute.xlu0 %410 }
 0x1d3   :  { %725 = vmatmul.mubr.msk.bf16.vlgmr.msra.gmra.mrb[4].mxu1 %vm123_vm2, %v110_v22  ;;  %v368_v38 = vsel %vm123_vm2, %v363_v37, 0  ;;  %v416_v40 = vsel %vm123_vm2, %v411_v39, 0 }
 0x1d4   :  { %735 = vmatpush3.bf16.xpose.msra.mxu1 %v320_v36  ;;  %736 = vmatprep.mubr.msk.bf16.mxu1 %vm833_vm1, %v830_v19 }
 0x1d5   :  { %746 = vmatprep.subr.bf16.mxu1 %v830_v19 }
 0x1d6   :  { %v459_v41 = vpop.permute.xlu1 %458 }
 0x1d7   :  { %731 = vmatmul.mubr.msk.bf16.vlgmr.msra.gmra.mrb[8].mxu0 %vm123_vm2, %v112_v24  ;;  %v464_v42 = vsel %vm123_vm2, %v459_v41, 0 }
 0x1d8   :  { %741 = vmatpush3.bf16.xpose.msra.mxu0 %v368_v38  ;;  %742 = vmatprep.mubr.msk.bf16.mxu0 %vm833_vm1, %v830_v19 }
 0x1d9   :  { %752 = vmatprep.subr.bf16.mxu0 %v830_v19 }
 0x1db   :  { %737 = vmatmul.mubr.msk.bf16.vlgmr.msra.gmra.mrb[8].mxu1 %vm123_vm2, %v114_v21 }
 0x1dc   :  { %747 = vmatpush3.bf16.xpose.msra.mxu1 %v416_v40  ;;  %748 = vmatprep.mubr.msk.bf16.mxu1 %vm833_vm1, %v830_v19 }
 0x1df   :  { %743 = vmatmul.mubr.msk.bf16.vlgmr.msra.gmra.mrb[12].mxu0 %vm123_vm2, %v116_v23 }
 0x1e0   :  { %753 = vmatpush3.bf16.xpose.msra.mxu0 %v464_v42  ;;  %754 = vmatprep.mubr.msk.bf16.mxu0 %vm833_vm1, %v830_v19 }
 0x1e3   :  { %749 = vmatmul.mubr.msk.bf16.vlgmr.msra.gmra.mrb[12].mxu1 %vm123_vm2, %v118_v26 }
 0x1e7   :  { %755 = vmatmul.mubr.msk.bf16.vlgmr.msra.gmra.mrb[16].mxu0 %vm123_vm2, %v120_v25 }
 0x23f   :  { %v164_v43 = vpop.f32.mrb[0].mxu1  ;;  %v212_v44 = vpop.f32.mrb[4].mxu0 }
 0x240   :  { %v714_v45 = vpop.f32.mrb[1].mxu1  ;;  %v720_v46 = vpop.f32.mrb[5].mxu0  ;;  %v510_v47 = vsel %vm506_vm3, %v212_v44, -inf  ;;  %v507_v48 = vsel %vm506_vm3, %v164_v43, -inf }
 0x241   :  { %v215_v49 = vpop.f32.mrb[6].mxu0  ;;  %511 = vmax.xlane.f32.xlu1 %v510_v47  ;;  %508 = vmax.xlane.f32.xlu0 %v507_v48  ;;  %v167_v50 = vpop.f32.mrb[2].mxu1 }
 0x242   :  { %v715_v51 = vpop.f32.mrb[3].mxu1  ;;  %v721_v52 = vpop.f32.mrb[7].mxu0 }
 0x2a6   :  { %v260_v53 = vpop.f32.mrb[4].mxu1 }
 0x2a7   :  { %v726_v54 = vpop.f32.mrb[5].mxu1  ;;  %v513_v55 = vsel %vm506_vm3, %v260_v53, -inf }
 0x2a8   :  { %514 = vmax.xlane.f32.xlu0 %v513_v55  ;;  %v263_v56 = vpop.f32.mrb[6].mxu1 }
 0x2a9   :  { %v727_v57 = vpop.f32.mrb[7].mxu1 }
 0x2aa   :  { %v308_v58 = vpop.f32.mrb[8].mxu0 }
 0x2ab   :  { %v732_v59 = vpop.f32.mrb[9].mxu0  ;;  %v516_v60 = vsel %vm506_vm3, %v308_v58, -inf }
 0x2ac   :  { %v311_v61 = vpop.f32.mrb[10].mxu0  ;;  %517 = vmax.xlane.f32.xlu0 %v516_v60 }
 0x2ad   :  { %v733_v62 = vpop.f32.mrb[11].mxu0 }
 0x2ae   :  { %v356_v63 = vpop.f32.mrb[8].mxu1 }
 0x2af   :  { %v738_v0 = vpop.f32.mrb[9].mxu1  ;;  %v519_v1 = vsel %vm506_vm3, %v356_v63, -inf }
 0x2b0   :  { %520 = vmax.xlane.f32.xlu1 %v519_v1  ;;  %v359_v2 = vpop.f32.mrb[10].mxu1 }
 0x2b1   :  { %v739_v3 = vpop.f32.mrb[11].mxu1 }
 0x2b2   :  { %v404_v4 = vpop.f32.mrb[12].mxu0 }
 0x2b3   :  { %v744_v5 = vpop.f32.mrb[13].mxu0  ;;  %v522_v6 = vsel %vm506_vm3, %v404_v4, -inf }
 0x2b4   :  { %v407_v7 = vpop.f32.mrb[14].mxu0  ;;  %523 = vmax.xlane.f32.xlu0 %v522_v6 }
 0x2b5   :  { %v745_v8 = vpop.f32.mrb[15].mxu0 }
 0x2b6   :  { %v452_v9 = vpop.f32.mrb[12].mxu1 }
 0x2b7   :  { %v750_v10 = vpop.f32.mrb[13].mxu1  ;;  %v525_v11 = vsel %vm506_vm3, %v452_v9, -inf }
 0x2b8   :  { %526 = vmax.xlane.f32.xlu1 %v525_v11  ;;  %v455_v12 = vpop.f32.mrb[14].mxu1 }
 0x2b9   :  { %v751_v13 = vpop.f32.mrb[15].mxu1 }
 0x2ba   :  { %v500_v14 = vpop.f32.mrb[16].mxu0 }
 0x2bb   :  { %v756_v15 = vpop.f32.mrb[17].mxu0  ;;  %v528_v16 = vsel %vm506_vm3, %v500_v14, -inf }
 0x2bc   :  { %v503_v17 = vpop.f32.mrb[18].mxu0  ;;  %529 = vmax.xlane.f32.xlu0 %v528_v16 }
 0x2bd   :  { %v757_v18 = vpop.f32.mrb[19].mxu0 }
 0x2ce   :  { %v512_v19 = vpop.xlane.xlu1 %511  ;;  %v509_v20 = vpop.xlane.xlu0 %508 }
 0x2cf   :  { %v532_v21 = vsub.f32 %v212_v44, %v512_v19  ;;  %v531_v22 = vsub.f32 %v164_v43, %v509_v20 }
 0x2d1   :  { %v541_v23 = vmul.f32 1.442695, %v532_v21  ;;  %v539_v24 = vmul.f32 1.442695, %v531_v22 }
 0x2d3   :  { %773 = vpow2.f32 %v541_v23 }
 0x2d4   :  { %775 = vpow2.f32 %v539_v24 }
 0x2dd   :  { %v931_v25 = vpop.eup %773 }
 0x2de   :  { %v776_v26 = vpop.eup %775  ;;  %v558_v27 = vsel %vm506_vm3, %v931_v25, 0.0 }
 0x2df   :  { %559 = vadd.xlane.f32.xlu0 %v558_v27  ;;  %v555_v28 = vsel %vm506_vm3, %v776_v26, 0.0 }
 0x2e0   :  { %556 = vadd.xlane.f32.xlu1 %v555_v28 }
 0x335   :  { %v515_v29 = vpop.xlane.xlu0 %514 }
 0x336   :  { %v533_v30 = vsub.f32 %v260_v53, %v515_v29 }
 0x338   :  { %v543_v31 = vmul.f32 1.442695, %v533_v30 }
 0x339   :  { %v518_v32 = vpop.xlane.xlu0 %517 }
 0x33a   :  { %777 = vpow2.f32 %v543_v31  ;;  %v534_v33 = vsub.f32 %v308_v58, %v518_v32 }
 0x33c   :  { %v545_v34 = vmul.f32 1.442695, %v534_v33 }
 0x33d   :  { %v521_v35 = vpop.xlane.xlu1 %520 }
 0x33e   :  { %779 = vpow2.f32 %v545_v34  ;;  %v535_v36 = vsub.f32 %v356_v63, %v521_v35 }
 0x340   :  { %v547_v37 = vmul.f32 1.442695, %v535_v36 }
 0x341   :  { %v524_v38 = vpop.xlane.xlu0 %523 }
 0x342   :  { %781 = vpow2.f32 %v547_v37  ;;  %v536_v39 = vsub.f32 %v404_v4, %v524_v38 }
 0x344   :  { %v778_v40 = vpop.eup %777  ;;  %v549_v41 = vmul.f32 1.442695, %v536_v39 }
 0x345   :  { %v527_v42 = vpop.xlane.xlu1 %526  ;;  %v561_v43 = vsel %vm506_vm3, %v778_v40, 0.0 }
 0x346   :  { %783 = vpow2.f32 %v549_v41  ;;  %v537_v44 = vsub.f32 %v452_v9, %v527_v42  ;;  %562 = vadd.xlane.f32.xlu1 %v561_v43 }
 0x348   :  { %v780_v45 = vpop.eup %779  ;;  %v551_v46 = vmul.f32 1.442695, %v537_v44 }
 0x349   :  { %v530_v47 = vpop.xlane.xlu0 %529  ;;  %v564_v48 = vsel %vm506_vm3, %v780_v45, 0.0 }
 0x34a   :  { %785 = vpow2.f32 %v551_v46  ;;  %v538_v49 = vsub.f32 %v500_v14, %v530_v47  ;;  %565 = vadd.xlane.f32.xlu0 %v564_v48 }
 0x34c   :  { %v782_v50 = vpop.eup %781  ;;  %v553_v51 = vmul.f32 1.442695, %v538_v49 }
 0x34d   :  { %v567_v52 = vsel %vm506_vm3, %v782_v50, 0.0 }
 0x34e   :  { %787 = vpow2.f32 %v553_v51  ;;  %568 = vadd.xlane.f32.xlu1 %v567_v52 }
 0x350   :  { %v784_v53 = vpop.eup %783 }
 0x351   :  { %v570_v54 = vsel %vm506_vm3, %v784_v53, 0.0 }
 0x352   :  { %571 = vadd.xlane.f32.xlu0 %v570_v54 }
 0x354   :  { %v786_v55 = vpop.eup %785 }
 0x355   :  { %v573_v56 = vsel %vm506_vm3, %v786_v55, 0.0 }
 0x356   :  { %574 = vadd.xlane.f32.xlu1 %v573_v56 }
 0x358   :  { %v941_v57 = vpop.eup %787 }
 0x359   :  { %v576_v58 = vsel %vm506_vm3, %v941_v57, 0.0 }
 0x35a   :  { %577 = vadd.xlane.f32.xlu0 %v576_v58 }
 0x36c   :  { %v560_v60 = vpop.xlane.xlu0 %559 }
 0x36d   :  { %v557_v59 = vpop.xlane.xlu1 %556 }
 0x36e   :  { %789 = vrcp.f32 %v557_v59 }
 0x36f   :  { %791 = vrcp.f32 %v560_v60 }
 0x378   :  { %v790_v63 = vpop.eup %789 }
 0x379   :  { %v792_v1 = vpop.eup %791  ;;  %v587_v3 = vmul.f32 %v790_v63, %v776_v26 }
 0x37a   :  { %v588_v6 = vmul.f32 %v792_v1, %v931_v25 }
 0x37b   :  { %v595_v9 = vsel %vm506_vm3, %v587_v3, 0.0 }
 0x37c   :  { %v602_v12 = vsel %vm506_vm3, %v588_v6, 0.0  ;;  %v596_v14 = vrot.slane %v595_v9, 4 }
 0x37d   :  { %v603_v18 = vrot.slane %v602_v12, 4 }
 0x37e   :  { %v597_v22 = vadd.f32 %v596_v14, %v595_v9 }
 0x37f   :  { %v604_v27 = vadd.f32 %v603_v18, %v602_v12 }
 0x380   :  { %v598_v31 = vrot.slane %v597_v22, 2 }
 0x381   :  { %v605_v37 = vrot.slane %v604_v27, 2 }
 0x382   :  { %v599_v42 = vadd.f32 %v598_v31, %v597_v22 }
 0x383   :  { %v606_v49 = vadd.f32 %v605_v37, %v604_v27 }
 0x384   :  { %v600_v54 = vrot.slane %v599_v42, 1 }
 0x385   :  { %v607_v60 = vrot.slane %v606_v49, 1 }
 0x386   :  { %v601_v1 = vadd.f32 %v600_v54, %v599_v42 }
 0x3d3   :  { %v563_v61 = vpop.xlane.xlu1 %562 }
 0x3d4   :  { %793 = vrcp.f32 %v563_v61 }
 0x3d7   :  { %v566_v62 = vpop.xlane.xlu0 %565 }
 0x3d8   :  { %795 = vrcp.f32 %v566_v62 }
 0x3db   :  { %v569_v0 = vpop.xlane.xlu1 %568 }
 0x3dc   :  { %797 = vrcp.f32 %v569_v0 }
 0x3de   :  { %v794_v2 = vpop.eup %793 }
 0x3df   :  { %v589_v4 = vmul.f32 %v794_v2, %v778_v40  ;;  %v572_v5 = vpop.xlane.xlu0 %571 }
 0x3e0   :  { %799 = vrcp.f32 %v572_v5  ;;  %v608_v5 = vadd.f32 %v607_v60, %v606_v49 }
 0x3e1   :  { %v609_v7 = vsel %vm506_vm3, %v589_v4, 0.0 }
 0x3e2   :  { %v796_v8 = vpop.eup %795  ;;  %v610_v13 = vrot.slane %v609_v7, 4 }
 0x3e3   :  { %v590_v10 = vmul.f32 %v796_v8, %v780_v45  ;;  %v575_v11 = vpop.xlane.xlu1 %574 }
 0x3e4   :  { %801 = vrcp.f32 %v575_v11  ;;  %v611_v21 = vadd.f32 %v610_v13, %v609_v7 }
 0x3e5   :  { %v616_v15 = vsel %vm506_vm3, %v590_v10, 0.0 }
 0x3e6   :  { %v798_v16 = vpop.eup %797  ;;  %v617_v17 = vrot.slane %v616_v15, 4  ;;  %v612_v29 = vrot.slane %v611_v21, 2 }
 0x3e7   :  { %v591_v19 = vmul.f32 %v798_v16, %v782_v50  ;;  %v578_v20 = vpop.xlane.xlu0 %577 }
 0x3e8   :  { %803 = vrcp.f32 %v578_v20  ;;  %v618_v25 = vadd.f32 %v617_v17, %v616_v15  ;;  %v613_v40 = vadd.f32 %v612_v29, %v611_v21 }
 0x3e9   :  { %v623_v23 = vsel %vm506_vm3, %v591_v19, 0.0 }
 0x3ea   :  { %v800_v24 = vpop.eup %799  ;;  %v624_v26 = vrot.slane %v623_v23, 4  ;;  %v619_v34 = vrot.slane %v618_v25, 2  ;;  %v614_v50 = vrot.slane %v613_v40, 1 }
 0x3eb   :  { %v592_v28 = vmul.f32 %v800_v24, %v784_v53 }
 0x3ec   :  { %v625_v30 = vadd.f32 %v624_v26, %v623_v23  ;;  %v620_v45 = vadd.f32 %v619_v34, %v618_v25  ;;  %v615_v61 = vadd.f32 %v614_v50, %v613_v40 }
 0x3ed   :  { %v630_v32 = vsel %vm506_vm3, %v592_v28, 0.0 }
 0x3ee   :  { %v802_v33 = vpop.eup %801  ;;  %v631_v35 = vrot.slane %v630_v32, 4  ;;  %v626_v36 = vrot.slane %v625_v30, 2  ;;  %v621_v56 = vrot.slane %v620_v45, 1  ;;  %v651_v9 = vadd.f32 %v615_v61, %v601_v1 }
 0x3ef   :  { %v593_v38 = vmul.f32 %v802_v33, %v786_v55 }
 0x3f0   :  { %v632_v39 = vadd.f32 %v631_v35, %v630_v32  ;;  %v627_v46 = vadd.f32 %v626_v36, %v625_v30  ;;  %v622_v2 = vadd.f32 %v621_v56, %v620_v45 }
 0x3f1   :  { %v637_v41 = vsel %vm506_vm3, %v593_v38, 0.0 }
 0x3f2   :  { %v804_v43 = vpop.eup %803  ;;  %v638_v44 = vrot.slane %v637_v41, 4  ;;  %v633_v47 = vrot.slane %v632_v39, 2  ;;  %v628_v58 = vrot.slane %v627_v46, 1  ;;  %v652_v11 = vadd.f32 %v622_v2, %v608_v5 }
 0x3f3   :  { %v594_v48 = vmul.f32 %v804_v43, %v941_v57 }
 0x3f4   :  { %v634_v51 = vadd.f32 %v633_v47, %v632_v39  ;;  %v639_v52 = vadd.f32 %v638_v44, %v637_v41  ;;  %v629_v3 = vadd.f32 %v628_v58, %v627_v46 }
 0x3f5   :  { %v644_v53 = vsel %vm506_vm3, %v594_v48, 0.0 }
 0x3f6   :  { %v645_v55 = vrot.slane %v644_v53, 4  ;;  %v640_v59 = vrot.slane %v639_v52, 2  ;;  %v635_v62 = vrot.slane %v634_v51, 1  ;;  %v653_v12 = vadd.f32 %v651_v9, %v629_v3 }
 0x3f8   :  { %v641_v63 = vadd.f32 %v640_v59, %v639_v52  ;;  %v646_v0 = vadd.f32 %v645_v55, %v644_v53  ;;  %v636_v6 = vadd.f32 %v635_v62, %v634_v51 }
 0x3fa   :  { %v642_v57 = vrot.slane %v641_v63, 1  ;;  %v647_v4 = vrot.slane %v646_v0, 2  ;;  %v654_v14 = vadd.f32 %v652_v11, %v636_v6 }
 0x3fc   :  { %v643_v7 = vadd.f32 %v642_v57, %v641_v63  ;;  %v648_v8 = vadd.f32 %v647_v4, %v646_v0 }
 0x3fe   :  { %v649_v10 = vrot.slane %v648_v8, 1  ;;  %v655_v15 = vadd.f32 %v653_v12, %v643_v7 }
 0x400   :  { %v650_v13 = vadd.f32 %v649_v10, %v648_v8  ;;  %v657_v17 = vmul.f32 0.03125, %v655_v15 }
 0x402   :  { %v656_v16 = vadd.f32 %v654_v14, %v650_v13 }
 0x404   :  { %v658_v18 = vmul.f32 0.03125, %v656_v16 }
 0x406   :  { %v662_v19 = vsel %vm661_vm4, %v658_v18, %v657_v17 }
 0x407   :  { %665 = vst.msk [vmem:[#allocation2] sm:$0x3] %vm664_vm5, %v662_v19 }
 0x408   :  { %816 = shalt.err (!%p813_p4)
}
 0x409   :  { %s817_s8 = scalar_lea.hbm %s971_s4, 32 }
 0x40a   :  { %p818_p5 = scmp.ne.s32.totalorder %s971_s4, %s817_s8  ;;  %p821_p6 = scmp.lt.u32.totalorder %s817_s8, %s971_s4 }
 0x40c   :  { %p823_p7 = pnand %p821_p6, %p818_p5 }
 0x40e   :  { %826 = shalt.err (!%p823_p7)
}
 0x40f   :  { %675 = dma.vmem_to_hbm [thread:$0]  %s673_s30, 32, %s971_s4, [#allocation3]  }
 0x410   :  { %827 = dma.done.wait [#allocation3], 32  }
 0x411   :  { %828 = vsyncadd [#allocation3], 4294967264 }
 0x412   :  { %679 = vsyncpa [#allocation3], 1 }

</bundles_post_ra>
